<compile_context>
chip_gen: v5e
topology: v5e:2x2
jax: 0.10.0
libtpu: 0.0.40
codegen_flags: <defaults>
</compile_context>

<pallas_src>
import jax
import jax.numpy as jnp
from jax.experimental import pallas as pl
from jax.experimental.pallas import tpu as pltpu


_MAX_LANES = 32768                     # widest lane-dense view tried (8K-32K per review)
_TARGET_BLOCK_BYTES = 2 * 1024 * 1024  # ~2 MiB per block; x4 (in+out, dbl-buffer) = 8 MiB


def _copy_kernel(x_ref, o_ref):
    o_ref[...] = x_ref[...]


def _pick_lane_width(total: int):
    """Largest multiple-of-128 divisor of `total`, capped at _MAX_LANES."""
    max_w = min(_MAX_LANES, total)
    max_w -= max_w % 128
    for w in range(max_w, 127, -128):
        if total % w == 0:
            return w
    return None


def _pick_tile_rows(rows: int, width: int, itemsize: int) -> int:
    """Row-tile size: ~2 MiB blocks, sublane-aligned, >=2 grid steps if possible."""
    max_rows = max(8, (_TARGET_BLOCK_BYTES // max(1, width * itemsize)) // 8 * 8)
    tile_rows = min(rows, max_rows)
    if rows > 8:
        # v7x has 2 TensorCores: make sure the "parallel" axis has >= 2 steps.
        tile_rows = min(tile_rows, pl.cdiv(rows, 2))
        # Keep the second-to-last block dim a multiple of 8 (sublane tiling).
        tile_rows = max(8, tile_rows - tile_rows % 8)
    # rows <= 8: tile_rows == rows (full dim), which is always a legal block dim.
    return tile_rows


def simple_transformer_block(x: jax.Array) -> jax.Array:
    """SimpleTransformerBlock.forward (identity) as a lane-dense tiled Pallas copy.

    Note: for a genuinely zero-cost identity at a jit boundary, the caller
    should simply reuse `x` (or donate its buffer); this kernel materializes a
    fresh output buffer at the HBM read+write roofline.
    """
    orig_shape = x.shape
    total = int(x.size)
    if total == 0:
        return x  # empty tensor: nothing to copy
    itemsize = x.dtype.itemsize

    width = _pick_lane_width(total)
    if width is None:
        # Odd total size: tile a (rows, last_dim) view.  Full last dim is a
        # legal block shape, so this never creates a whole-array VMEM block.
        width = int(orig_shape[-1]) if x.ndim >= 1 else 1
    rows = total // width
    x2 = x.reshape(rows, width)

    tile_rows = _pick_tile_rows(rows, width, itemsize)
    grid = (pl.cdiv(rows, tile_rows),)

    y2 = pl.pallas_call(
        _copy_kernel,
        out_shape=jax.ShapeDtypeStruct((rows, width), x.dtype),
        grid=grid,
        in_specs=[pl.BlockSpec((tile_rows, width), lambda i: (i, 0))],
        out_specs=pl.BlockSpec((tile_rows, width), lambda i: (i, 0)),
        compiler_params=pltpu.CompilerParams(
            dimension_semantics=("parallel",),
        ),
        cost_estimate=pl.CostEstimate(
            flops=0,
            transcendentals=0,
            bytes_accessed=2 * total * itemsize,
        ),
    )(x2)
    return y2.reshape(orig_shape)


if __name__ == "__main__":
    key = jax.random.PRNGKey(0)

    # Shapes consistent with a transformer block input: (batch, seq, hidden).
    batch, seq, hidden = 2, 8, 32
    x = jax.random.normal(key, (batch, seq, hidden), dtype=jnp.float32)
    y = simple_transformer_block(x)
    jax.block_until_ready(y)
    assert y.shape == x.shape and y.dtype == x.dtype
    assert bool(jnp.all(y == x))

    # Exercise the odd-size fallback path (trailing dim not a multiple of 128).
    x_odd = jax.random.normal(key, (batch, seq, 31), dtype=jnp.float32)
    y_odd = simple_transformer_block(x_odd)
    jax.block_until_ready(y_odd)
    assert y_odd.shape == x_odd.shape and y_odd.dtype == x_odd.dtype
    assert bool(jnp.all(y_odd == x_odd))

    print("KERNEL_OK")
</pallas_src>

<mosaic_0001>
module attributes {stable_mosaic.version = 11 : i64} {
  func.func @_copy_kernel(%arg0: i32, %arg1: memref<1x512xf32, #tpu.memory_space<vmem>>, %arg2: memref<1x512xf32, #tpu.memory_space<vmem>>) attributes {dimension_semantics = [#tpu.dimension_semantics<parallel>], iteration_bounds = array<i64: 1>, scalar_prefetch = 0 : i64, scratch_operands = 0 : i64, tpu.core_type = #tpu.core_type<tc>, window_params = [{transform_indices = @transform_0, window_bounds = array<i64: 1, 512>}, {transform_indices = @transform_1, window_bounds = array<i64: 1, 512>}]} {
    %c0 = arith.constant 0 : index
    %c0_0 = arith.constant 0 : index
    %0 = vector.load %arg1[%c0, %c0_0] : memref<1x512xf32, #tpu.memory_space<vmem>>, vector<1x512xf32>
    %c0_1 = arith.constant 0 : index
    %c0_2 = arith.constant 0 : index
    %1 = vector.load %arg2[%c0_1, %c0_2] : memref<1x512xf32, #tpu.memory_space<vmem>>, vector<1x512xf32>
    tpu.vector_store %arg2[%c0_1, %c0_2], %0 {strides = array<i32>} : memref<1x512xf32, #tpu.memory_space<vmem>>, vector<1x512xf32>,
    return
  }
  func.func @transform_0(%arg0: i32) -> (i32, i32) {
    %c0_i32 = arith.constant 0 : i32
    %c0_i32_0 = arith.constant 0 : i32
    return %arg0, %c0_i32 : i32, i32
  }
  func.func @transform_1(%arg0: i32) -> (i32, i32) {
    %c0_i32 = arith.constant 0 : i32
    %c0_i32_0 = arith.constant 0 : i32
    return %arg0, %c0_i32 : i32, i32
  }
}

</mosaic_0001>

<bundles_post_ra>
// kernel: tpu_custom_call.1
= control target key start
LH: loop header
LB: loop body
LE: loop exit
PB: predicated region body
PF: predicated region fallthrough
CT: control target
= control target key end

     0   :  { %6 = vsyncpa [#allocation3], 0  ;;  %s118_s0 = inlined_call_operand.hbm [shape: f32[1,512], index: 0, kind: input, shape index: {}]   ;;  %s119_s1 = inlined_call_operand.hbm [shape: f32[1,512], index: 1, kind: output, shape index: {}]  }
   0x1   :  { %7 = vsyncpa [#allocation4], 0  ;;  %s13_s8 = sshll.u32 %s118_s0, 4  ;;  %s100_s9 = smov [#allocation2]   ;;  %s14_s8 = int_to_ptr.hbm [resolvable:$true] %s13_s8 }
   0x2   :  { %s15_s10 = sshll.u32 %s100_s9, 4  ;;  %s16_s10 = int_to_ptr.vmem [resolvable:$true] %s15_s10 }
   0x3   :  { %18 = dma.hbm_to_vmem [thread:$0]  %s14_s8, 64, %s16_s10, [#allocation3]  }
   0x4   :  { %96 = dma.done.wait [#allocation3], 64  }
   0x5   :  { %97 = vsyncadd [#allocation3], 4294967232  ;;  %v24_v0 = vlaneseq  ;;  %s101_s11 = smov [#allocation5]   ;;  %s36_s15 = sshll.u32 %s119_s1, 4  ;;  %v23_v1 = vld [vmem:[#allocation2] sm:$0xf]  ;;  %s37_s15 = int_to_ptr.hbm [resolvable:$true] %s36_s15 }
   0x6   :  { %s34_s12 = sshll.u32 %s101_s11, 4  ;;  %s35_s12 = int_to_ptr.vmem [resolvable:$true] %s34_s12 }
   0x7   :  { %vm26_vm0 = vcmp.lt.s32.totalorder %v24_v0, 512 }
   0x8   :  { %28 = vst.msk [vmem:[#allocation5] sm:$0xf] %vm26_vm0, %v23_v1 }
   0x9   :  { %39 = dma.vmem_to_hbm [thread:$0]  %s35_s12, 64, %s37_s15, [#allocation4]  }
   0xa   :  { %98 = dma.done.wait [#allocation4], 64  }
   0xb   :  { %99 = vsyncadd [#allocation4], 4294967232 }
   0xc   :  { %44 = vsyncpa [#allocation3], 1 }
   0xd   :  { %45 = vsyncpa [#allocation4], 1 }

</bundles_post_ra>
